<compile_context>
chip_gen: v5e
topology: v5e:2x2
jax: 0.10.0
libtpu: 0.0.40
codegen_flags: <defaults>
</compile_context>

<pallas_src>
import jax
import jax.numpy as jnp
from jax.experimental import pallas as pl
from jax.experimental.pallas import tpu as pltpu


def _round_up(x, m):
    return (x + m - 1) // m * m


# ------------------------------ Pallas kernel ------------------------------

def _gru_steps_kernel(gi_ref, whh_ref, bhh_ref, h0_ref, out_ref, h_carry):
    """One chunk of TT GRU timesteps per grid iteration (grid axis 0 = time chunks).

    gi_ref : (TT, Bp, 3*Hp) f32   precomputed x@Wih^T + b_ih, gate slices at
                                  lane offsets [0, Hp, 2*Hp) (order r|z|n)
    whh_ref: (Hp, 3*Hp)     bf16  recurrent weights (VMEM-resident), cols [r|z|n]
    bhh_ref: (1, 3*Hp)      f32   recurrent bias (VMEM-resident)
    h0_ref : (Bp, Hp)       f32   initial hidden state (VMEM-resident)
    out_ref: (TT, Bp, Hp)   f32   per-step hidden outputs for this chunk
    h_carry: (Bp, Hp)       f32   VMEM scratch: hidden carried across chunks
    """
    Hp = h0_ref.shape[1]
    TT = gi_ref.shape[0]

    @pl.when(pl.program_id(0) == 0)
    def _():
        h_carry[...] = h0_ref[...]

    w = whh_ref[...]                       # loaded once per chunk
    b = bhh_ref[...]

    def step(t, h):
        gi = gi_ref[t]                                              # (Bp, 3Hp)
        gh = jnp.dot(h.astype(w.dtype), w,
                     preferred_element_type=jnp.float32) + b        # (Bp, 3Hp)
        r = jax.nn.sigmoid(gi[:, 0:Hp] + gh[:, 0:Hp])
        z = jax.nn.sigmoid(gi[:, Hp:2 * Hp] + gh[:, Hp:2 * Hp])
        n = jnp.tanh(gi[:, 2 * Hp:3 * Hp] + r * gh[:, 2 * Hp:3 * Hp])
        h_new = (1.0 - z) * n + z * h
        out_ref[t] = h_new
        return h_new

    h_carry[...] = jax.lax.fori_loop(0, TT, step, h_carry[...], unroll=True)


def _vmem_limit_bytes(TT, Bp, Hp):
    """Actual resident + double-buffered footprint, clamped to [32 MiB, 48 MiB]."""
    resident = Hp * 3 * Hp * 2          # whh (bf16)
    resident += 3 * Hp * 4              # bhh
    resident += 2 * Bp * Hp * 4         # h0 + carry scratch
    streamed = 2 * (TT * Bp * 3 * Hp * 4 + TT * Bp * Hp * 4)   # gi in + out, x2 buffers
    need = resident + streamed
    return int(min(48 * 1024 * 1024, max(32 * 1024 * 1024, 2 * need)))


def _gru_run_padded(gi, whh, bhh, h0, TT):
    """Run the recurrent kernel on padded inputs. gi: (Tp, Bp, 3*Hp)."""
    Tp, Bp, three_hp = gi.shape
    Hp = three_hp // 3
    nT = Tp // TT

    out_seq = pl.pallas_call(
        _gru_steps_kernel,
        out_shape=jax.ShapeDtypeStruct((Tp, Bp, Hp), jnp.float32),
        grid_spec=pltpu.PrefetchScalarGridSpec(
            num_scalar_prefetch=0,
            grid=(nT,),
            in_specs=[
                pl.BlockSpec((TT, Bp, 3 * Hp), lambda i: (i, 0, 0)),   # GI chunk (streamed)
                pl.BlockSpec((Hp, 3 * Hp), lambda i: (0, 0)),          # Whh (resident)
                pl.BlockSpec((1, 3 * Hp), lambda i: (0, 0)),           # b_hh (resident)
                pl.BlockSpec((Bp, Hp), lambda i: (0, 0)),              # h0 (resident)
            ],
            out_specs=pl.BlockSpec((TT, Bp, Hp), lambda i: (i, 0, 0)), # lane-dense output
            scratch_shapes=[pltpu.VMEM((Bp, Hp), jnp.float32)],        # hidden carry
        ),
        compiler_params=pltpu.CompilerParams(
            dimension_semantics=("arbitrary",),        # time chunks are a sequential carry
            vmem_limit_bytes=_vmem_limit_bytes(TT, Bp, Hp),
        ),
    )(gi, whh, bhh, h0)
    return out_seq


# ------------------------------ host wrappers ------------------------------

def encoder_rnn_encode(tokens, hidden, prepared, time_block=8):
    """Fused multi-step encoder: equivalent to calling EncoderRNN.forward once
    per timestep while carrying `hidden` (eval-mode dropout).

    tokens: (T, B) int32 ; hidden: (1, B, H) f32.
    Returns (outputs (T, B, H), hidden (1, B, H)).
    """
    T, B = tokens.shape
    H, Hp = prepared["H"], prepared["Hp"]
    Bp = _round_up(B, 8)
    TT = min(time_block, T)
    Tp = _round_up(T, TT)

    # ---- input-side path hoisted out of the recurrence (one parallel matmul) ----
    # nn.Dropout in eval mode is the identity on the embedded input.
    x = prepared["embedding"][tokens]                                  # (T, B, H)
    gi_raw = (jnp.einsum("tbh,hg->tbg", x, prepared["wih_t"],
                         precision=jax.lax.Precision.HIGHEST)
              + prepared["bias_ih"])                                   # (T, B, 3H) [r|z|n]

    # Pad to lane-aligned gate slices [0:Hp | Hp:2Hp | 2Hp:3Hp]; padded lanes,
    # padded batch rows, and padded timesteps are zeros (exact for the real slice).
    gi = jnp.zeros((Tp, Bp, 3 * Hp), jnp.float32)
    for g in range(3):
        gi = gi.at[:T, :B, g * Hp:g * Hp + H].set(gi_raw[..., g * H:(g + 1) * H])

    h0 = jnp.zeros((Bp, Hp), jnp.float32).at[:B, :H].set(hidden.reshape(B, H))

    out_seq = _gru_run_padded(gi, prepared["whh"], prepared["bhh"], h0, TT)

    outputs = out_seq[:T, :B, :H]
    h_final = out_seq[T - 1, :B, :H][None]     # final hidden == last real timestep
    return outputs, h_final


def encoder_rnn_forward(token_ids, hidden, prepared):
    """Equivalent of EncoderRNN.forward(input, hidden, batch_size=B) (eval mode).

    token_ids: (B,) int32 ; hidden: (1, B, H) f32.
    Returns (output, hidden), each (1, B, H) (identical for a 1-step, 1-layer GRU).
    """
    outs, h_final = encoder_rnn_encode(token_ids[None, :], hidden, prepared)
    return outs[0][None], h_final


def prepare_params(params, recurrent_dtype=jnp.bfloat16):
    """One-time parameter preparation (transpose + pad + cast); reused every call."""
    _, H = params["embedding"].shape
    Hp = _round_up(H, 128)          # hidden on lanes; 3*Hp columns stay lane-aligned

    whh_t = params["weight_hh"].T.astype(jnp.float32)    # (H, 3H), cols [r|z|n]
    whh = jnp.zeros((Hp, 3 * Hp), jnp.float32)
    bhh = jnp.zeros((1, 3 * Hp), jnp.float32)
    for g in range(3):
        whh = whh.at[:H, g * Hp:g * Hp + H].set(whh_t[:, g * H:(g + 1) * H])
        bhh = bhh.at[0, g * Hp:g * Hp + H].set(params["bias_hh"][g * H:(g + 1) * H])

    return {
        "embedding": params["embedding"].astype(jnp.float32),   # used in XLA precompute
        "wih_t": params["weight_ih"].T.astype(jnp.float32),     # (H, 3H), XLA precompute
        "bias_ih": params["bias_ih"].astype(jnp.float32),
        "whh": whh.astype(recurrent_dtype),                     # bf16 recurrent weight
        "bhh": bhh,                                             # f32 recurrent bias
        "H": H, "Hp": Hp,
    }


# ----------------------------- pure-JAX reference -----------------------------

def encoder_rnn_reference(token_ids, hidden, params):
    """Pure-JAX f32 reference of one forward step (eval-mode dropout)."""
    hi = jax.lax.Precision.HIGHEST
    x = params["embedding"][token_ids]                      # (B, H)
    h = hidden[0]                                           # (B, H)
    H = h.shape[1]
    gi = jnp.dot(x, params["weight_ih"].T, precision=hi) + params["bias_ih"]
    gh = jnp.dot(h, params["weight_hh"].T, precision=hi) + params["bias_hh"]
    r = jax.nn.sigmoid(gi[:, :H] + gh[:, :H])
    z = jax.nn.sigmoid(gi[:, H:2 * H] + gh[:, H:2 * H])
    n = jnp.tanh(gi[:, 2 * H:] + r * gh[:, 2 * H:])
    h_new = (1.0 - z) * n + z * h
    return h_new[None], h_new[None]


def encoder_rnn_sequence_reference(tokens, hidden, params):
    """Calls the one-step reference T times carrying hidden."""
    h = hidden
    outs = []
    for t in range(tokens.shape[0]):
        out, h = encoder_rnn_reference(tokens[t], h, params)
        outs.append(out[0])
    return jnp.stack(outs), h


def init_params(key, input_size, hidden_size):
    """Deterministic parameter init matching the module's shapes."""
    k_emb, k_wih, k_whh, k_bih, k_bhh = jax.random.split(key, 5)
    bound = 1.0 / (hidden_size ** 0.5)
    return {
        # nn.Embedding(input_size, hidden_size): N(0, 1)
        "embedding": jax.random.normal(k_emb, (input_size, hidden_size), jnp.float32),
        # nn.GRU(hidden_size, hidden_size): U(-1/sqrt(H), 1/sqrt(H))
        "weight_ih": jax.random.uniform(k_wih, (3 * hidden_size, hidden_size),
                                        jnp.float32, -bound, bound),
        "weight_hh": jax.random.uniform(k_whh, (3 * hidden_size, hidden_size),
                                        jnp.float32, -bound, bound),
        "bias_ih": jax.random.uniform(k_bih, (3 * hidden_size,),
                                      jnp.float32, -bound, bound),
        "bias_hh": jax.random.uniform(k_bhh, (3 * hidden_size,),
                                      jnp.float32, -bound, bound),
    }


if __name__ == "__main__":
    input_size = 16    # vocab size
    hidden_size = 32
    batch_size = 2
    seq_len = 8

    key = jax.random.PRNGKey(0)
    k_params, k_tok, k_h = jax.random.split(key, 3)
    params = init_params(k_params, input_size, hidden_size)
    prepared = prepare_params(params)   # one-time transpose/pad/cast

    tokens = jax.random.randint(k_tok, (seq_len, batch_size), 0, input_size, jnp.int32)
    hidden0 = jnp.zeros((1, batch_size, hidden_size), jnp.float32)           # initHidden
    hidden_rand = 0.1 * jax.random.normal(k_h, (1, batch_size, hidden_size), jnp.float32)

    # --- single step: exact module.forward semantics ---
    out1, hid1 = encoder_rnn_forward(tokens[0], hidden_rand, prepared)
    jax.block_until_ready((out1, hid1))
    out1_ref, hid1_ref = encoder_rnn_reference(tokens[0], hidden_rand, params)
    assert out1.shape == (1, batch_size, hidden_size)
    assert hid1.shape == (1, batch_size, hidden_size)
    # bf16 Whh in the recurrence -> slightly looser than a pure-f32 comparison.
    assert jnp.allclose(out1, out1_ref, atol=1e-2, rtol=1e-2)
    assert jnp.allclose(hid1, hid1_ref, atol=1e-2, rtol=1e-2)

    # --- fused multi-step: module applied per timestep, carried hidden ---
    outs, hid = encoder_rnn_encode(tokens, hidden0, prepared)
    jax.block_until_ready((outs, hid))
    outs_ref, hid_ref = encoder_rnn_sequence_reference(tokens, hidden0, params)
    assert outs.shape == (seq_len, batch_size, hidden_size)
    assert hid.shape == (1, batch_size, hidden_size)
    # bf16 recurrent weight + 8 recurrent steps of drift (gate math stays f32).
    assert jnp.allclose(outs, outs_ref, atol=2e-2, rtol=2e-2)
    assert jnp.allclose(hid, hid_ref, atol=2e-2, rtol=2e-2)

    print("KERNEL_OK")
</pallas_src>

<mosaic_0001>
module attributes {stable_mosaic.version = 11 : i64} {
  func.func @_gru_steps_kernel(%arg0: i32, %arg1: memref<1x8x384xf32, #tpu.memory_space<vmem>>, %arg2: memref<128x384xbf16, #tpu.memory_space<vmem>>, %arg3: memref<1x384xf32, #tpu.memory_space<vmem>>, %arg4: memref<8x128xf32, #tpu.memory_space<vmem>>, %arg5: memref<1x8x128xf32, #tpu.memory_space<vmem>>, %arg6: memref<8x128xf32, #tpu.memory_space<vmem>>) attributes {dimension_semantics = [#tpu.dimension_semantics<arbitrary>], iteration_bounds = array<i64: 1>, scalar_prefetch = 0 : i64, scratch_operands = 1 : i64, tpu.core_type = #tpu.core_type<tc>, window_params = [{transform_indices = @transform_0, window_bounds = array<i64: 1, 8, 384>}, {pipeline_mode = #tpu.pipeline_mode<synchronous>, transform_indices = @transform_1, window_bounds = array<i64: 128, 384>}, {pipeline_mode = #tpu.pipeline_mode<synchronous>, transform_indices = @transform_2, window_bounds = array<i64: 1, 384>}, {pipeline_mode = #tpu.pipeline_mode<synchronous>, transform_indices = @transform_3, window_bounds = array<i64: 8, 128>}, {transform_indices = @transform_4, window_bounds = array<i64: 1, 8, 128>}]} {
    %c0_i32 = arith.constant 0 : i32
    %0 = arith.cmpi eq, %arg0, %c0_i32 : i32
    %1 = arith.extui %0 : i1 to i32
    %c0_i32_0 = arith.constant 0 : i32
    %2 = arith.cmpi ne, %1, %c0_i32_0 : i32
    scf.if %2 {
      %c0_16 = arith.constant 0 : index
      %c0_17 = arith.constant 0 : index
      %44 = vector.load %arg4[%c0_16, %c0_17] : memref<8x128xf32, #tpu.memory_space<vmem>>, vector<8x128xf32>
      %c0_18 = arith.constant 0 : index
      %c0_19 = arith.constant 0 : index
      %45 = vector.load %arg6[%c0_18, %c0_19] : memref<8x128xf32, #tpu.memory_space<vmem>>, vector<8x128xf32>
      tpu.vector_store %arg6[%c0_18, %c0_19], %44 {strides = array<i32>} : memref<8x128xf32, #tpu.memory_space<vmem>>, vector<8x128xf32>,
    } else {
    }
    %c0 = arith.constant 0 : index
    %c0_1 = arith.constant 0 : index
    %3 = vector.load %arg2[%c0, %c0_1] : memref<128x384xbf16, #tpu.memory_space<vmem>>, vector<128x384xbf16>
    %c0_2 = arith.constant 0 : index
    %c0_3 = arith.constant 0 : index
    %4 = vector.load %arg3[%c0_2, %c0_3] : memref<1x384xf32, #tpu.memory_space<vmem>>, vector<1x384xf32>
    %c0_4 = arith.constant 0 : index
    %c0_5 = arith.constant 0 : index
    %5 = vector.load %arg6[%c0_4, %c0_5] : memref<8x128xf32, #tpu.memory_space<vmem>>, vector<8x128xf32>
    %c0_i32_6 = arith.constant 0 : i32
    %6 = arith.index_cast %c0_i32_6 : i32 to index
    %c0_7 = arith.constant 0 : index
    %c0_8 = arith.constant 0 : index
    %7 = vector.load %arg1[%6, %c0_7, %c0_8] : memref<1x8x384xf32, #tpu.memory_space<vmem>>, vector<1x8x384xf32>
    %8 = vector.shape_cast %7 : vector<1x8x384xf32> to vector<8x384xf32>
    %9 = arith.truncf %5 : vector<8x128xf32> to vector<8x128xbf16>
    %cst = arith.constant dense<0.000000e+00> : vector<8x384xf32>
    %10 = tpu.matmul %9, %3, %cst {dimension_numbers = #tpu.dot_dimension_numbers<[1], [0], [0], [1], [0, 0, 1, 1], [], []>} : vector<8x128xbf16>, vector<128x384xbf16>, vector<8x384xf32> -> vector<8x384xf32>
    %11 = vector.broadcast %4 : vector<1x384xf32> to vector<8x384xf32>
    %12 = arith.addf %10, %11 : vector<8x384xf32>
    %13 = vector.extract_strided_slice %8 {offsets = [0, 0], sizes = [8, 128], strides = [1, 1]} : vector<8x384xf32> to vector<8x128xf32>
    %14 = vector.extract_strided_slice %12 {offsets = [0, 0], sizes = [8, 128], strides = [1, 1]} : vector<8x384xf32> to vector<8x128xf32>
    %15 = arith.addf %13, %14 : vector<8x128xf32>
    %16 = arith.negf %15 : vector<8x128xf32>
    %17 = math.exp %16 : vector<8x128xf32>
    %cst_9 = arith.constant 1.000000e+00 : f32
    %18 = vector.broadcast %cst_9 : f32 to vector<8x128xf32>
    %19 = arith.addf %18, %17 : vector<8x128xf32>
    %20 = arith.divf %18, %19 : vector<8x128xf32>
    %21 = vector.extract_strided_slice %8 {offsets = [0, 128], sizes = [8, 128], strides = [1, 1]} : vector<8x384xf32> to vector<8x128xf32>
    %22 = vector.extract_strided_slice %12 {offsets = [0, 128], sizes = [8, 128], strides = [1, 1]} : vector<8x384xf32> to vector<8x128xf32>
    %23 = arith.addf %21, %22 : vector<8x128xf32>
    %24 = arith.negf %23 : vector<8x128xf32>
    %25 = math.exp %24 : vector<8x128xf32>
    %cst_10 = arith.constant 1.000000e+00 : f32
    %26 = vector.broadcast %cst_10 : f32 to vector<8x128xf32>
    %27 = arith.addf %26, %25 : vector<8x128xf32>
    %28 = arith.divf %26, %27 : vector<8x128xf32>
    %29 = vector.extract_strided_slice %8 {offsets = [0, 256], sizes = [8, 128], strides = [1, 1]} : vector<8x384xf32> to vector<8x128xf32>
    %30 = vector.extract_strided_slice %12 {offsets = [0, 256], sizes = [8, 128], strides = [1, 1]} : vector<8x384xf32> to vector<8x128xf32>
    %31 = arith.mulf %20, %30 : vector<8x128xf32>
    %32 = arith.addf %29, %31 : vector<8x128xf32>
    %33 = math.tanh %32 : vector<8x128xf32>
    %cst_11 = arith.constant 1.000000e+00 : f32
    %34 = vector.broadcast %cst_11 : f32 to vector<8x128xf32>
    %35 = arith.subf %34, %28 : vector<8x128xf32>
    %36 = arith.mulf %35, %33 : vector<8x128xf32>
    %37 = arith.mulf %28, %5 : vector<8x128xf32>
    %38 = arith.addf %36, %37 : vector<8x128xf32>
    %39 = arith.index_cast %c0_i32_6 : i32 to index
    %c0_12 = arith.constant 0 : index
    %c0_13 = arith.constant 0 : index
    %40 = vector.load %arg5[%39, %c0_12, %c0_13] : memref<1x8x128xf32, #tpu.memory_space<vmem>>, vector<1x8x128xf32>
    %41 = vector.shape_cast %40 : vector<1x8x128xf32> to vector<8x128xf32>
    %42 = vector.shape_cast %38 : vector<8x128xf32> to vector<1x8x128xf32>
    tpu.vector_store %arg5[%39, %c0_12, %c0_13], %42 {strides = array<i32>} : memref<1x8x128xf32, #tpu.memory_space<vmem>>, vector<1x8x128xf32>,
    %c1_i32 = arith.constant 1 : i32
    %c0_14 = arith.constant 0 : index
    %c0_15 = arith.constant 0 : index
    %43 = vector.load %arg6[%c0_14, %c0_15] : memref<8x128xf32, #tpu.memory_space<vmem>>, vector<8x128xf32>
    tpu.vector_store %arg6[%c0_14, %c0_15], %38 {strides = array<i32>} : memref<8x128xf32, #tpu.memory_space<vmem>>, vector<8x128xf32>,
    return
  }
  func.func @transform_0(%arg0: i32) -> (i32, i32, i32) {
    %c0_i32 = arith.constant 0 : i32
    %c0_i32_0 = arith.constant 0 : i32
    %c0_i32_1 = arith.constant 0 : i32
    return %arg0, %c0_i32, %c0_i32_0 : i32, i32, i32
  }
  func.func @transform_1(%arg0: i32) -> (i32, i32) {
    %c0_i32 = arith.constant 0 : i32
    %c0_i32_0 = arith.constant 0 : i32
    %c0_i32_1 = arith.constant 0 : i32
    return %c0_i32, %c0_i32_0 : i32, i32
  }
  func.func @transform_2(%arg0: i32) -> (i32, i32) {
    %c0_i32 = arith.constant 0 : i32
    %c0_i32_0 = arith.constant 0 : i32
    %c0_i32_1 = arith.constant 0 : i32
    return %c0_i32, %c0_i32_0 : i32, i32
  }
  func.func @transform_3(%arg0: i32) -> (i32, i32) {
    %c0_i32 = arith.constant 0 : i32
    %c0_i32_0 = arith.constant 0 : i32
    %c0_i32_1 = arith.constant 0 : i32
    return %c0_i32, %c0_i32_0 : i32, i32
  }
  func.func @transform_4(%arg0: i32) -> (i32, i32, i32) {
    %c0_i32 = arith.constant 0 : i32
    %c0_i32_0 = arith.constant 0 : i32
    %c0_i32_1 = arith.constant 0 : i32
    return %arg0, %c0_i32, %c0_i32_0 : i32, i32, i32
  }
}

</mosaic_0001>

<bundles_post_ra>
// kernel: tpu_custom_call.1
= control target key start
LH: loop header
LB: loop body
LE: loop exit
PB: predicated region body
PF: predicated region fallthrough
CT: control target
= control target key end

     0   :  { %9 = vsyncpa [#allocation4], 0  ;;  %s680_s0 = inlined_call_operand.hbm [shape: f32[1,8,384], index: 0, kind: input, shape index: {}]   ;;  %s681_s1 = inlined_call_operand.hbm [shape: bf16[128,384], index: 1, kind: input, shape index: {}]   ;;  %s682_s2 = inlined_call_operand.hbm [shape: f32[1,384], index: 2, kind: input, shape index: {}]   ;;  %s683_s3 = inlined_call_operand.hbm [shape: f32[8,128], index: 3, kind: input, shape index: {}]   ;;  %s684_s4 = inlined_call_operand.hbm [shape: f32[1,8,128], index: 4, kind: output, shape index: {}]  }
   0x1   :  { %10 = vsyncpa [#allocation7], 0 }
   0x2   :  { %11 = vsyncpa [#allocation10], 0  ;;  %s28_s17 = sshll.u32 %s681_s1, 4  ;;  %s29_s17 = int_to_ptr.hbm [resolvable:$true] %s28_s17 }
   0x3   :  { %12 = vsyncpa [#allocation5], 0  ;;  %s628_s18 = smov [#allocation6]   ;;  %s18_s22 = sshll.u32 %s680_s0, 4  ;;  %s19_s22 = int_to_ptr.hbm [resolvable:$true] %s18_s22 }
   0x4   :  { %s30_s19 = sshll.u32 %s628_s18, 4  ;;  %s629_s23 = smov 192   ;;  %s31_s19 = int_to_ptr.vmem [resolvable:$true] %s30_s19 }
   0x5   :  { %s630_s24 = smov 12   ;;  %s631_s25 = smov [#allocation3]  }
   0x6   :  { %36 = dma.hbm_to_vmem [thread:$0]  %s29_s17, 3072, %s31_s19, [#allocation7], %s629_s23, %s629_s23, %s630_s24  }
   0x7   :  { %s20_s26 = sshll.u32 %s631_s25, 4  ;;  %s42_s29 = sshll.u32 %s682_s2, 4  ;;  %s21_s26 = int_to_ptr.vmem [resolvable:$true] %s20_s26  ;;  %s43_s29 = int_to_ptr.hbm [resolvable:$true] %s42_s29 }
   0x8   :  { %23 = dma.hbm_to_vmem [thread:$0]  %s19_s22, 384, %s21_s26, [#allocation4]  }
   0x9   :  { %s53_s5 = sshll.u32 %s683_s3, 4  ;;  %s632_s6 = smov [#allocation8]   ;;  %s54_s5 = int_to_ptr.hbm [resolvable:$true] %s53_s5 }
   0xa   :  { %s44_s7 = sshll.u32 %s632_s6, 4  ;;  %s633_s0 = smov [#allocation9]   ;;  %s45_s7 = int_to_ptr.vmem [resolvable:$true] %s44_s7 }
   0xb   :  { %47 = dma.hbm_to_vmem [thread:$0]  %s43_s29, 48, %s45_s7, [#allocation7]  }
   0xc   :  { %s55_s8 = sshll.u32 %s633_s0, 4  ;;  %s56_s8 = int_to_ptr.vmem [resolvable:$true] %s55_s8 }
   0xd   :  { %58 = dma.hbm_to_vmem [thread:$0]  %s54_s5, 128, %s56_s8, [#allocation10]  }
   0xe   :  { %620 = dma.done.wait [#allocation4], 384  }
   0xf   :  { %621 = vsyncadd [#allocation4], 4294966912 }
  0x10   :  { %622 = dma.done.wait [#allocation7], 3120  }
  0x11   :  { %623 = vsyncadd [#allocation7], 4294964176 }
  0x12   :  { %624 = dma.done.wait [#allocation10], 128  }
  0x13   :  { %625 = vsyncadd [#allocation10], 4294967168  ;;  %v447_v0 = vld [vmem:[#allocation6 + $0xa8] sm:$0xf]  ;;  %v481_v1 = vld [vmem:[#allocation6 + $0xb0] sm:$0xf0] }
  0x14   :  { %v480_v2 = vld [vmem:[#allocation6 + $0xac] sm:$0xf]  ;;  %v448_v3 = vor.u32 %v481_v1, %v447_v0  ;;  %v449_v4 = vld [vmem:[#allocation6 + $0xb4] sm:$0xf0]  ;;  %v435_v5 = vld [vmem:[#allocation6 + $0x90] sm:$0xf] }
  0x15   :  { %v478_v6 = vld [vmem:[#allocation6 + $0x98] sm:$0xf0]  ;;  %v452_v7 = vor.u32 %v480_v2, %v449_v4  ;;  %v477_v8 = vld [vmem:[#allocation6 + $0x94] sm:$0xf]  ;;  %v437_v9 = vld [vmem:[#allocation6 + $0x9c] sm:$0xf0] }
  0x16   :  { %254 = vmatpush.bf16.msra.mxu0 %v448_v3  ;;  %v436_v10 = vor.u32 %v478_v6, %v435_v5  ;;  %v440_v11 = vor.u32 %v477_v8, %v437_v9  ;;  %v423_v12 = vld [vmem:[#allocation6 + $0x78] sm:$0xf]  ;;  %v475_v13 = vld [vmem:[#allocation6 + $0x80] sm:$0xf0]  ;;  %v474_v14 = vld [vmem:[#allocation6 + $0x7c] sm:$0xf] }
  0x17   :  { %267 = vmatpush.bf16.msra.mxu1 %v452_v7  ;;  %v425_v15 = vld [vmem:[#allocation6 + $0x84] sm:$0xf0]  ;;  %v455_v16 = vld [vmem:[#allocation6 + $0xb0] sm:$0xf]  ;;  %v424_v17 = vor.u32 %v475_v13, %v423_v12  ;;  %v482_v18 = vld [vmem:[#allocation6 + $0xb8] sm:$0xf0] }
  0x18   :  { %v428_v19 = vor.u32 %v474_v14, %v425_v15  ;;  %v411_v20 = vld [vmem:[#allocation6 + $0x60] sm:$0xf]  ;;  %v472_v21 = vld [vmem:[#allocation6 + $0x68] sm:$0xf0]  ;;  %v456_v22 = vor.u32 %v482_v18, %v455_v16  ;;  %v443_v23 = vld [vmem:[#allocation6 + $0x98] sm:$0xf] }
  0x19   :  { %v471_v24 = vld [vmem:[#allocation6 + $0x64] sm:$0xf]  ;;  %v413_v25 = vld [vmem:[#allocation6 + $0x6c] sm:$0xf0]  ;;  %v412_v28 = vor.u32 %v472_v21, %v411_v20  ;;  %v431_v29 = vld [vmem:[#allocation6 + $0x80] sm:$0xf] }
  0x1a   :  { %255 = vmatpush.bf16.msra.mxu0 %v436_v10  ;;  %v479_v26 = vld [vmem:[#allocation6 + $0xa0] sm:$0xf0]  ;;  %280 = vmatpush.bf16.msra.mxu2 %v456_v22  ;;  %v476_v30 = vld [vmem:[#allocation6 + $0x88] sm:$0xf0]  ;;  %v416_v31 = vor.u32 %v471_v24, %v413_v25  ;;  %v399_v32 = vld [vmem:[#allocation6 + $0x48] sm:$0xf] }
  0x1b   :  { %268 = vmatpush.bf16.msra.mxu1 %v440_v11  ;;  %v444_v27 = vor.u32 %v479_v26, %v443_v23  ;;  %v469_v33 = vld [vmem:[#allocation6 + $0x50] sm:$0xf0]  ;;  %v468_v34 = vld [vmem:[#allocation6 + $0x4c] sm:$0xf]  ;;  %v401_v35 = vld [vmem:[#allocation6 + $0x54] sm:$0xf0]  ;;  %v432_v36 = vor.u32 %v476_v30, %v431_v29 }
  0x1c   :  { %v400_v37 = vor.u32 %v469_v33, %v399_v32  ;;  %v419_v38 = vld [vmem:[#allocation6 + $0x68] sm:$0xf]  ;;  %v473_v39 = vld [vmem:[#allocation6 + $0x70] sm:$0xf0]  ;;  %v404_v40 = vor.u32 %v468_v34, %v401_v35  ;;  %v387_v41 = vld [vmem:[#allocation6 + $0x30] sm:$0xf] }
  0x1d   :  { %v466_v42 = vld [vmem:[#allocation6 + $0x38] sm:$0xf0]  ;;  %v465_v43 = vld [vmem:[#allocation6 + $0x34] sm:$0xf]  ;;  %v389_v44 = vld [vmem:[#allocation6 + $0x3c] sm:$0xf0]  ;;  %v420_v45 = vor.u32 %v473_v39, %v419_v38 }
  0x1e   :  { %256 = vmatpush.bf16.msra.mxu0 %v424_v17  ;;  %281 = vmatpush.bf16.msra.mxu2 %v444_v27  ;;  %v388_v46 = vor.u32 %v466_v42, %v387_v41  ;;  %v407_v47 = vld [vmem:[#allocation6 + $0x50] sm:$0xf]  ;;  %v470_v48 = vld [vmem:[#allocation6 + $0x58] sm:$0xf0]  ;;  %v392_v49 = vor.u32 %v465_v43, %v389_v44  ;;  %v375_v50 = vld [vmem:[#allocation6 + $0x18] sm:$0xf] }
  0x1f   :  { %269 = vmatpush.bf16.msra.mxu1 %v428_v19  ;;  %v463_v51 = vld [vmem:[#allocation6 + $0x20] sm:$0xf0]  ;;  %v462_v52 = vld [vmem:[#allocation6 + $0x1c] sm:$0xf]  ;;  %v377_v53 = vld [vmem:[#allocation6 + $0x24] sm:$0xf0]  ;;  %v408_v54 = vor.u32 %v470_v48, %v407_v47 }
  0x20   :  { %v376_v55 = vor.u32 %v463_v51, %v375_v50  ;;  %v395_v56 = vld [vmem:[#allocation6 + $0x38] sm:$0xf]  ;;  %v467_v57 = vld [vmem:[#allocation6 + $0x40] sm:$0xf0]  ;;  %v380_v58 = vor.u32 %v462_v52, %v377_v53  ;;  %v363_v59 = vld [vmem:[#allocation6] sm:$0xf] }
  0x21   :  { %v460_v60 = vld [vmem:[#allocation6 + $0x8] sm:$0xf0]  ;;  %v459_v61 = vld [vmem:[#allocation6 + $0x4] sm:$0xf]  ;;  %v365_v62 = vld [vmem:[#allocation6 + $0xc] sm:$0xf0]  ;;  %v396_v63 = vor.u32 %v467_v57, %v395_v56 }
  0x22   :  { %257 = vmatpush.bf16.msra.mxu0 %v412_v28  ;;  %282 = vmatpush.bf16.msra.mxu2 %v432_v36  ;;  %v364_v0 = vor.u32 %v460_v60, %v363_v59  ;;  %v672_v1 = vld [vmem:[#allocation9] sm:$0xff]  ;;  %v383_v2 = vld [vmem:[#allocation6 + $0x20] sm:$0xf]  ;;  %v464_v3 = vld [vmem:[#allocation6 + $0x28] sm:$0xf0]  ;;  %v368_v4 = vor.u32 %v459_v61, %v365_v62  ;;  %s634_s2 = smov [#allocation11]  }
  0x23   :  { %270 = vmatpush.bf16.msra.mxu1 %v416_v31  ;;  %v118_v5 = vpack.c.bf16 %v672_v1, %v672_v1  ;;  %v384_v6 = vor.u32 %v464_v3, %v383_v2  ;;  %v371_v7 = vld [vmem:[#allocation6 + $0x8] sm:$0xf]  ;;  %v461_v8 = vld [vmem:[#allocation6 + $0x10] sm:$0xf0]  ;;  %v113_v10 = vld [vmem:[#allocation8] sm:$0x7] }
  0x24   :  { %v372_v9 = vor.u32 %v461_v8, %v371_v7  ;;  %v120_v11 = vperm.slane %v113_v10, 0  ;;  %v121_v12 = vperm.slane %v113_v10, 1  ;;  %v115_v13 = vld [vmem:[#allocation3] sm:$0xff]  ;;  %v116_v16 = vld [vmem:[#allocation3 + $0x8] sm:$0xff]  ;;  %v122_v35 = vperm.slane %v113_v10, 2  ;;  %s347_s3 = sshll.u32 %s634_s2, 4  ;;  %s348_s3 = int_to_ptr.vmem [resolvable:$true] %s347_s3 }
  0x25   :  { %s349_s11 = sshll.u32 %s684_s4, 4  ;;  %s350_s11 = int_to_ptr.hbm [resolvable:$true] %s349_s11 }
  0x26   :  { %258 = vmatpush.bf16.msra.mxu0 %v400_v37  ;;  %283 = vmatpush.bf16.msra.mxu2 %v420_v45 }
  0x27   :  { %271 = vmatpush.bf16.msra.mxu1 %v404_v40 }
  0x2a   :  { %259 = vmatpush.bf16.msra.mxu0 %v388_v46  ;;  %284 = vmatpush.bf16.msra.mxu2 %v408_v54  ;;  %v117_v46 = vld [vmem:[#allocation3 + $0x10] sm:$0xff] }
  0x2b   :  { %272 = vmatpush.bf16.msra.mxu1 %v392_v49 }
  0x2e   :  { %260 = vmatpush.bf16.msra.mxu0 %v376_v55  ;;  %285 = vmatpush.bf16.msra.mxu2 %v396_v63 }
  0x2f   :  { %273 = vmatpush.bf16.msra.mxu1 %v380_v58 }
  0x32   :  { %261 = vmatpush.bf16.msra.mxu0 %v364_v0  ;;  %286 = vmatpush.bf16.msra.mxu2 %v384_v6 }
  0x33   :  { %274 = vmatpush.bf16.msra.mxu1 %v368_v4 }
  0x35   :  { %262 = vmatmul.bf16.vlgmr.msra.gmra.mxu0 %v118_v5 }
  0x36   :  { %275 = vmatmul.bf16.vlgmr.msra.gmra.mxu1 %v118_v5  ;;  %287 = vmatpush.bf16.msra.mxu2 %v372_v9 }
  0x39   :  { %288 = vmatmul.bf16.vlgmr.msra.gmra.mxu2 %v118_v5 }
  0xb2   :  { %v263_v14 = vpop.f32.mrf.mxu0 }
  0xb3   :  { %v264_v15 = vadd.f32 %v263_v14, %v120_v11  ;;  %v276_v17 = vpop.f32.mrf.mxu1 }
  0xb4   :  { %v277_v18 = vadd.f32 %v276_v17, %v121_v12 }
  0xb5   :  { %v293_v19 = vadd.f32 %v264_v15, %v115_v13 }
  0xb6   :  { %v313_v20 = vadd.f32 %v277_v18, %v116_v16 }
  0xb7   :  { %v457_v21 = vmul.f32 -1.442695, %v293_v19 }
  0xb8   :  { %v458_v22 = vmul.f32 -1.442695, %v313_v20 }
  0xb9   :  { %490 = vpow2.f32 %v457_v21 }
  0xba   :  { %492 = vpow2.f32 %v458_v22  ;;  %v265_v23 = vpop.f32.mrf.mxu0 }
  0xbb   :  { %v278_v24 = vpop.f32.mrf.mxu1 }
  0xbc   :  { %v289_v26 = vpop.f32.mrf.mxu2 }
  0xbd   :  { %v290_v42 = vadd.f32 %v289_v26, %v122_v35 }
  0xbf   :  { %v491_v25 = vpop.eup %490 }
  0xc0   :  { %v493_v27 = vpop.eup %492  ;;  %v297_v28 = vadd.f32 1.0, %v491_v25 }
  0xc1   :  { %v317_v29 = vadd.f32 1.0, %v493_v27 }
  0xc2   :  { %494 = vrcp.f32 %v297_v28  ;;  %v309_v38 = vand.u32 2147483648, %v297_v28  ;;  %v307_v40 = vand.u32 2147483647, %v297_v28  ;;  %vm303_vm1 = vweird.f32 %v297_v28 }
  0xc3   :  { %496 = vrcp.f32 %v317_v29  ;;  %vm323_vm4 = vweird.f32 %v317_v29  ;;  %v329_v50 = vand.u32 2147483648, %v317_v29  ;;  %v327_v51 = vand.u32 2147483647, %v317_v29 }
  0xc4   :  { %v291_v30 = vpop.f32.mrf.mxu2  ;;  %v310_v44 = vor.u32 1.1754944e-38, %v309_v38  ;;  %vm308_vm3 = vcmp.eq.f32.partialorder %v307_v40, 8.507059e+37 }
  0xc5   :  { %v330_v54 = vor.u32 1.1754944e-38, %v329_v50  ;;  %vm328_vm7 = vcmp.eq.f32.partialorder %v327_v51, 8.507059e+37 }
  0xc8   :  { %v495_v31 = vpop.eup %494 }
  0xc9   :  { %v497_v32 = vpop.eup %496  ;;  %v299_v33 = vmul.f32 %v495_v31, %v297_v28  ;;  %vm304_vm0 = vweird.f32 %v495_v31 }
  0xca   :  { %v319_v34 = vmul.f32 %v497_v32, %v317_v29  ;;  %vm305_vm2 = vmor %vm303_vm1, %vm304_vm0  ;;  %vm324_vm5 = vweird.f32 %v497_v32 }
  0xcb   :  { %v300_v36 = vsub.f32 1.0, %v299_v33  ;;  %vm325_vm6 = vmor %vm323_vm4, %vm324_vm5 }
  0xcc   :  { %v320_v37 = vsub.f32 1.0, %v319_v34 }
  0xcd   :  { %v301_v39 = vmul.f32 %v495_v31, %v300_v36 }
  0xce   :  { %v321_v41 = vmul.f32 %v497_v32, %v320_v37 }
  0xcf   :  { %v302_v43 = vadd.f32 %v495_v31, %v301_v39 }
  0xd0   :  { %v322_v48 = vadd.f32 %v497_v32, %v321_v41 }
  0xd1   :  { %v306_v45 = vsel %vm305_vm2, %v495_v31, %v302_v43 }
  0xd2   :  { %v311_v47 = vsel %vm308_vm3, %v310_v44, %v306_v45  ;;  %v326_v53 = vsel %vm325_vm6, %v497_v32, %v322_v48 }
  0xd3   :  { %v333_v49 = vmul.f32 %v311_v47, %v290_v42  ;;  %v331_v55 = vsel %vm328_vm7, %v330_v54, %v326_v53 }
  0xd4   :  { %v336_v56 = vsub.f32 1.0, %v331_v55  ;;  %v338_v59 = vmul.f32 %v331_v55, %v672_v1 }
  0xd5   :  { %v334_v52 = vadd.f32 %v333_v49, %v117_v46 }
  0xd7   :  { %498 = vtanh.f32 %v334_v52 }
  0xdd   :  { %v499_v57 = vpop.eup %498 }
  0xde   :  { %v337_v58 = vmul.f32 %v499_v57, %v336_v56 }
  0xe0   :  { %v339_v60 = vadd.f32 %v338_v59, %v337_v58 }
  0xe2   :  { %340 = vst [vmem:[#allocation11] sm:$0xff] %v339_v60 }
  0xe3   :  { %352 = dma.vmem_to_hbm [thread:$0]  %s348_s3, 128, %s350_s11, [#allocation5]  }
  0xe4   :  { %626 = dma.done.wait [#allocation5], 128  }
  0xe5   :  { %627 = vsyncadd [#allocation5], 4294967168 }
  0xe6   :  { %357 = vsyncpa [#allocation4], 1 }
  0xe7   :  { %358 = vsyncpa [#allocation7], 1 }
  0xe8   :  { %359 = vsyncpa [#allocation10], 1 }
  0xe9   :  { %360 = vsyncpa [#allocation5], 1 }

</bundles_post_ra>
